<compile_context>
chip_gen: v5e
topology: v5e:2x2
jax: 0.10.0
libtpu: 0.0.40
codegen_flags: <defaults>
</compile_context>

<pallas_src>
import jax
import jax.numpy as jnp
from jax.experimental import pallas as pl
from jax.experimental.pallas import tpu as pltpu

SUBLANE = 8


def _round_up(n, m):
    return ((n + m - 1) // m) * m


def dynnet_kernel(x_ref, w1_ref, b1_ref, w2_ref, b2_ref, w3_ref, b3_ref, o_ref):
    # One batch tile per grid step; all weights/biases resident in VMEM.
    # Activations are cast to the weight dtype before each dot (identity for f32,
    # bf16 fast-path when params were cast); accumulation is always f32.
    wdt = w1_ref.dtype
    x = x_ref[...]                                                     # (bt, 6)
    h1 = jnp.dot(x.astype(wdt), w1_ref[...],
                 preferred_element_type=jnp.float32) + b1_ref[...]     # (bt, 128)
    h1 = jnp.maximum(h1, 0.0)
    h2 = jnp.dot(h1.astype(wdt), w2_ref[...],
                 preferred_element_type=jnp.float32) + b2_ref[...]     # (bt, 128)
    h2 = jnp.maximum(h2, 0.0)
    out = jnp.dot(h2.astype(wdt), w3_ref[...],
                  preferred_element_type=jnp.float32) + b3_ref[...]    # (bt, 4)
    o_ref[...] = out.astype(o_ref.dtype)


def dynnet_forward(x, params, *, block_batch=1024):
    w1, b1, w2, b2, w3, b3 = params
    B, fin = x.shape               # (B, 6)
    hid = w1.shape[1]              # 128
    fout = w3.shape[1]             # 4

    # Batch tile: multiple of 8 sublanes (defensively rounded), capped by B.
    block_batch = _round_up(max(block_batch, SUBLANE), SUBLANE)
    bt = min(_round_up(B, SUBLANE), block_batch)
    grid = (pl.cdiv(B, bt),)       # ragged trailing tile handled by Pallas

    # Weights/biases: constant block index -> resident in VMEM, single DMA.
    resident = lambda shape: pl.BlockSpec(shape, lambda i: (0,) * len(shape))

    out = pl.pallas_call(
        dynnet_kernel,
        out_shape=jax.ShapeDtypeStruct((B, fout), jnp.float32),
        grid_spec=pl.GridSpec(
            grid=grid,
            in_specs=[
                pl.BlockSpec((bt, fin), lambda i: (i, 0)),   # x: streamed, last dim == full (6)
                resident((fin, hid)), resident((1, hid)),    # w1 (6,128), b1
                resident((hid, hid)), resident((1, hid)),    # w2, b2
                resident((hid, fout)), resident((1, fout)),  # w3 (128,4), b3
            ],
            out_specs=pl.BlockSpec((bt, fout), lambda i: (i, 0)),  # (bt, 4) lane dim == full
        ),
        compiler_params=pltpu.CompilerParams(
            dimension_semantics=("parallel",),  # batch tiles shard across TCs on v7x
        ),
    )(x, w1, b1, w2, b2, w3, b3)

    return out


def cast_params_bf16(params):
    """Optional bandwidth/MXU fast path (exceeds 1e-5 allclose; keep f32 to validate)."""
    return tuple(p.astype(jnp.bfloat16) for p in params)


def init_params(key):
    """Deterministic init mimicking torch.nn.Linear (uniform +-1/sqrt(fan_in))."""
    def linear(key, fan_in, fan_out):
        kw, kb = jax.random.split(key)
        bound = 1.0 / jnp.sqrt(fan_in)
        # stored as (in, out) so the kernel computes x @ W
        w = jax.random.uniform(kw, (fan_in, fan_out), jnp.float32, -bound, bound)
        b = jax.random.uniform(kb, (1, fan_out), jnp.float32, -bound, bound)
        return w, b

    k1, k2, k3 = jax.random.split(key, 3)
    w1, b1 = linear(k1, 6, 128)
    w2, b2 = linear(k2, 128, 128)
    w3, b3 = linear(k3, 128, 4)
    return (w1, b1, w2, b2, w3, b3)


if __name__ == "__main__":
    key = jax.random.PRNGKey(0)
    kx, kp = jax.random.split(key)

    batch = 8
    x = jax.random.normal(kx, (batch, 6), dtype=jnp.float32)
    params = init_params(kp)

    out = dynnet_forward(x, params)
    out = jax.block_until_ready(out)

    # reference check in plain JAX
    w1, b1, w2, b2, w3, b3 = params
    ref = jnp.maximum(x @ w1 + b1, 0.0)
    ref = jnp.maximum(ref @ w2 + b2, 0.0)
    ref = ref @ w3 + b3
    assert out.shape == (batch, 4)
    assert jnp.allclose(out, ref, atol=1e-5, rtol=1e-5)

    print("KERNEL_OK")
</pallas_src>

<mosaic_0001>
module attributes {stable_mosaic.version = 11 : i64} {
  func.func @dynnet_kernel(%arg0: i32, %arg1: memref<8x6xf32, #tpu.memory_space<vmem>>, %arg2: memref<6x128xf32, #tpu.memory_space<vmem>>, %arg3: memref<1x128xf32, #tpu.memory_space<vmem>>, %arg4: memref<128x128xf32, #tpu.memory_space<vmem>>, %arg5: memref<1x128xf32, #tpu.memory_space<vmem>>, %arg6: memref<128x4xf32, #tpu.memory_space<vmem>>, %arg7: memref<1x4xf32, #tpu.memory_space<vmem>>, %arg8: memref<8x4xf32, #tpu.memory_space<vmem>>) attributes {dimension_semantics = [#tpu.dimension_semantics<parallel>], iteration_bounds = array<i64: 1>, scalar_prefetch = 0 : i64, scratch_operands = 0 : i64, tpu.core_type = #tpu.core_type<tc>, window_params = [{transform_indices = @transform_0, window_bounds = array<i64: 8, 6>}, {pipeline_mode = #tpu.pipeline_mode<synchronous>, transform_indices = @transform_1, window_bounds = array<i64: 6, 128>}, {pipeline_mode = #tpu.pipeline_mode<synchronous>, transform_indices = @transform_2, window_bounds = array<i64: 1, 128>}, {pipeline_mode = #tpu.pipeline_mode<synchronous>, transform_indices = @transform_3, window_bounds = array<i64: 128, 128>}, {pipeline_mode = #tpu.pipeline_mode<synchronous>, transform_indices = @transform_4, window_bounds = array<i64: 1, 128>}, {pipeline_mode = #tpu.pipeline_mode<synchronous>, transform_indices = @transform_5, window_bounds = array<i64: 128, 4>}, {pipeline_mode = #tpu.pipeline_mode<synchronous>, transform_indices = @transform_6, window_bounds = array<i64: 1, 4>}, {transform_indices = @transform_7, window_bounds = array<i64: 8, 4>}]} {
    %c0 = arith.constant 0 : index
    %c0_0 = arith.constant 0 : index
    %0 = vector.load %arg1[%c0, %c0_0] : memref<8x6xf32, #tpu.memory_space<vmem>>, vector<8x6xf32>
    %c0_1 = arith.constant 0 : index
    %c0_2 = arith.constant 0 : index
    %1 = vector.load %arg2[%c0_1, %c0_2] : memref<6x128xf32, #tpu.memory_space<vmem>>, vector<6x128xf32>
    %cst = arith.constant dense<0.000000e+00> : vector<8x128xf32>
    %2 = tpu.matmul %0, %1, %cst {dimension_numbers = #tpu.dot_dimension_numbers<[1], [0], [0], [1], [0, 0, 1, 1], [], []>} : vector<8x6xf32>, vector<6x128xf32>, vector<8x128xf32> -> vector<8x128xf32>
    %c0_3 = arith.constant 0 : index
    %c0_4 = arith.constant 0 : index
    %3 = vector.load %arg3[%c0_3, %c0_4] : memref<1x128xf32, #tpu.memory_space<vmem>>, vector<1x128xf32>
    %4 = vector.broadcast %3 : vector<1x128xf32> to vector<8x128xf32>
    %5 = arith.addf %2, %4 : vector<8x128xf32>
    %cst_5 = arith.constant 0.000000e+00 : f32
    %6 = vector.broadcast %cst_5 : f32 to vector<8x128xf32>
    %7 = arith.maximumf %5, %6 : vector<8x128xf32>
    %c0_6 = arith.constant 0 : index
    %c0_7 = arith.constant 0 : index
    %8 = vector.load %arg4[%c0_6, %c0_7] : memref<128x128xf32, #tpu.memory_space<vmem>>, vector<128x128xf32>
    %cst_8 = arith.constant dense<0.000000e+00> : vector<8x128xf32>
    %9 = tpu.matmul %7, %8, %cst_8 {dimension_numbers = #tpu.dot_dimension_numbers<[1], [0], [0], [1], [0, 0, 1, 1], [], []>} : vector<8x128xf32>, vector<128x128xf32>, vector<8x128xf32> -> vector<8x128xf32>
    %c0_9 = arith.constant 0 : index
    %c0_10 = arith.constant 0 : index
    %10 = vector.load %arg5[%c0_9, %c0_10] : memref<1x128xf32, #tpu.memory_space<vmem>>, vector<1x128xf32>
    %11 = vector.broadcast %10 : vector<1x128xf32> to vector<8x128xf32>
    %12 = arith.addf %9, %11 : vector<8x128xf32>
    %cst_11 = arith.constant 0.000000e+00 : f32
    %13 = vector.broadcast %cst_11 : f32 to vector<8x128xf32>
    %14 = arith.maximumf %12, %13 : vector<8x128xf32>
    %c0_12 = arith.constant 0 : index
    %c0_13 = arith.constant 0 : index
    %15 = vector.load %arg6[%c0_12, %c0_13] : memref<128x4xf32, #tpu.memory_space<vmem>>, vector<128x4xf32>
    %cst_14 = arith.constant dense<0.000000e+00> : vector<8x4xf32>
    %16 = tpu.matmul %14, %15, %cst_14 {dimension_numbers = #tpu.dot_dimension_numbers<[1], [0], [0], [1], [0, 0, 1, 1], [], []>} : vector<8x128xf32>, vector<128x4xf32>, vector<8x4xf32> -> vector<8x4xf32>
    %c0_15 = arith.constant 0 : index
    %c0_16 = arith.constant 0 : index
    %17 = vector.load %arg7[%c0_15, %c0_16] : memref<1x4xf32, #tpu.memory_space<vmem>>, vector<1x4xf32>
    %18 = vector.broadcast %17 : vector<1x4xf32> to vector<8x4xf32>
    %19 = arith.addf %16, %18 : vector<8x4xf32>
    %c0_17 = arith.constant 0 : index
    %c0_18 = arith.constant 0 : index
    %20 = vector.load %arg8[%c0_17, %c0_18] : memref<8x4xf32, #tpu.memory_space<vmem>>, vector<8x4xf32>
    tpu.vector_store %arg8[%c0_17, %c0_18], %19 {strides = array<i32>} : memref<8x4xf32, #tpu.memory_space<vmem>>, vector<8x4xf32>,
    return
  }
  func.func @transform_0(%arg0: i32) -> (i32, i32) {
    %c0_i32 = arith.constant 0 : i32
    %c0_i32_0 = arith.constant 0 : i32
    return %arg0, %c0_i32 : i32, i32
  }
  func.func @transform_1(%arg0: i32) -> (i32, i32) {
    %c0_i32 = arith.constant 0 : i32
    %c0_i32_0 = arith.constant 0 : i32
    %c0_i32_1 = arith.constant 0 : i32
    return %c0_i32, %c0_i32_0 : i32, i32
  }
  func.func @transform_2(%arg0: i32) -> (i32, i32) {
    %c0_i32 = arith.constant 0 : i32
    %c0_i32_0 = arith.constant 0 : i32
    %c0_i32_1 = arith.constant 0 : i32
    return %c0_i32, %c0_i32_0 : i32, i32
  }
  func.func @transform_3(%arg0: i32) -> (i32, i32) {
    %c0_i32 = arith.constant 0 : i32
    %c0_i32_0 = arith.constant 0 : i32
    %c0_i32_1 = arith.constant 0 : i32
    return %c0_i32, %c0_i32_0 : i32, i32
  }
  func.func @transform_4(%arg0: i32) -> (i32, i32) {
    %c0_i32 = arith.constant 0 : i32
    %c0_i32_0 = arith.constant 0 : i32
    %c0_i32_1 = arith.constant 0 : i32
    return %c0_i32, %c0_i32_0 : i32, i32
  }
  func.func @transform_5(%arg0: i32) -> (i32, i32) {
    %c0_i32 = arith.constant 0 : i32
    %c0_i32_0 = arith.constant 0 : i32
    %c0_i32_1 = arith.constant 0 : i32
    return %c0_i32, %c0_i32_0 : i32, i32
  }
  func.func @transform_6(%arg0: i32) -> (i32, i32) {
    %c0_i32 = arith.constant 0 : i32
    %c0_i32_0 = arith.constant 0 : i32
    %c0_i32_1 = arith.constant 0 : i32
    return %c0_i32, %c0_i32_0 : i32, i32
  }
  func.func @transform_7(%arg0: i32) -> (i32, i32) {
    %c0_i32 = arith.constant 0 : i32
    %c0_i32_0 = arith.constant 0 : i32
    return %arg0, %c0_i32 : i32, i32
  }
}

</mosaic_0001>

<bundles_post_ra>
// kernel: tpu_custom_call.1
= control target key start
LH: loop header
LB: loop body
LE: loop exit
PB: predicated region body
PF: predicated region fallthrough
CT: control target
= control target key end

     0   :  { %12 = vsyncpa [#allocation3], 0  ;;  %s393_s0 = inlined_call_operand.hbm [shape: f32[8,6], index: 0, kind: input, shape index: {}]   ;;  %s394_s1 = inlined_call_operand.hbm [shape: f32[6,128], index: 1, kind: input, shape index: {}]   ;;  %s395_s2 = inlined_call_operand.vmem [shape: f32[1,128], index: 2, kind: input, shape index: {}]   ;;  %s396_s3 = inlined_call_operand.vmem [shape: f32[128,128], index: 3, kind: input, shape index: {}]   ;;  %s397_s4 = inlined_call_operand.vmem [shape: f32[1,128], index: 4, kind: input, shape index: {}]   ;;  %s398_s5 = inlined_call_operand.vmem [shape: f32[128,4], index: 5, kind: input, shape index: {}]   ;;  %s399_s6 = inlined_call_operand.vmem [shape: f32[1,4], index: 6, kind: input, shape index: {}]   ;;  %s400_s7 = inlined_call_operand.vmem [shape: f32[8,4], index: 7, kind: output, shape index: {}]  }
   0x1   :  { %s19_s26 = sshll.u32 %s393_s0, 4  ;;  %s20_s26 = int_to_ptr.hbm [resolvable:$true] %s19_s26 }
   0x2   :  { %13 = vsyncpa [#allocation5], 0  ;;  %s237_s27 = smov [#allocation2]   ;;  %s30_s8 = sshll.u32 %s394_s1, 4  ;;  %s31_s8 = int_to_ptr.hbm [resolvable:$true] %s30_s8 }
   0x3   :  { %s21_s28 = sshll.u32 %s237_s27, 4  ;;  %s238_s9 = smov [#allocation4]   ;;  %s22_s28 = int_to_ptr.vmem [resolvable:$true] %s21_s28 }
   0x4   :  { %24 = dma.hbm_to_vmem [thread:$0]  %s20_s26, 128, %s22_s28, [#allocation3]  }
   0x5   :  { %s32_s10 = sshll.u32 %s238_s9, 4  ;;  %s33_s10 = int_to_ptr.vmem [resolvable:$true] %s32_s10 }
   0x6   :  { %35 = dma.hbm_to_vmem [thread:$0]  %s31_s8, 128, %s33_s10, [#allocation5]  }
   0x7   :  { %233 = dma.done.wait [#allocation3], 128  }
   0x8   :  { %234 = vsyncadd [#allocation3], 4294967168 }
   0x9   :  { %235 = dma.done.wait [#allocation5], 128  }
   0xa   :  { %236 = vsyncadd [#allocation5], 4294967168  ;;  %vm64_vm0 = vcmask 1045504   ;;  %vm60_vm1 = vcmask 48128   ;;  %v55_v0 = vld [vmem:[#allocation4] sm:$0x3f] }
   0xb   :  { %v54_v1 = vld [vmem:[#allocation2] sm:$0xff]  ;;  %v104_v2 = vld [vmem:[%s396_s3 + $0x78] sm:$0xff]  ;;  %178 = vmatpush.msk.msra.mxu0 %vm64_vm0, %v55_v0  ;;  %v103_v3 = vld [vmem:[%s396_s3 + $0x70] sm:$0xff]  ;;  %vm170_vm2 = vcmask 31744  }
   0xc   :  { %109 = vmatpush.msra.mxu1 %v104_v2  ;;  %179 = vmatmul.msk.f32.vlgmr.msra.gmra.mxu0 %vm60_vm1, %v54_v1  ;;  %v102_v4 = vld [vmem:[%s396_s3 + $0x68] sm:$0xff]  ;;  %v101_v5 = vld [vmem:[%s396_s3 + $0x60] sm:$0xff]  ;;  %v100_v6 = vld [vmem:[%s396_s3 + $0x58] sm:$0xff] }
   0xd   :  { %v99_v7 = vld [vmem:[%s396_s3 + $0x50] sm:$0xff]  ;;  %v98_v8 = vld [vmem:[%s396_s3 + $0x48] sm:$0xff]  ;;  %v97_v9 = vld [vmem:[%s396_s3 + $0x40] sm:$0xff] }
   0xe   :  { %110 = vmatpush.msra.mxu1 %v103_v3  ;;  %v96_v10 = vld [vmem:[%s396_s3 + $0x38] sm:$0xff]  ;;  %v95_v11 = vld [vmem:[%s396_s3 + $0x30] sm:$0xff]  ;;  %v94_v12 = vld [vmem:[%s396_s3 + $0x28] sm:$0xff] }
   0xf   :  { %v93_v13 = vld [vmem:[%s396_s3 + $0x20] sm:$0xff]  ;;  %v92_v14 = vld [vmem:[%s396_s3 + $0x18] sm:$0xff]  ;;  %v91_v15 = vld [vmem:[%s396_s3 + $0x10] sm:$0xff] }
  0x10   :  { %111 = vmatpush.msra.mxu1 %v102_v4  ;;  %v90_v16 = vld [vmem:[%s396_s3 + $0x8] sm:$0xff]  ;;  %v89_v17 = vld [vmem:[%s396_s3] sm:$0xff]  ;;  %v145_v18 = vld [vmem:[%s398_s5 + $0x78] sm:$0xff] }
  0x11   :  { %v144_v19 = vld [vmem:[%s398_s5 + $0x70] sm:$0xff]  ;;  %150 = vmatpush.msra.mxu2 %v145_v18  ;;  %v143_v20 = vld [vmem:[%s398_s5 + $0x68] sm:$0xff]  ;;  %v142_v21 = vld [vmem:[%s398_s5 + $0x60] sm:$0xff] }
  0x12   :  { %112 = vmatpush.msra.mxu1 %v101_v5  ;;  %v141_v22 = vld [vmem:[%s398_s5 + $0x58] sm:$0xff]  ;;  %v140_v23 = vld [vmem:[%s398_s5 + $0x50] sm:$0xff]  ;;  %v139_v24 = vld [vmem:[%s398_s5 + $0x48] sm:$0xff] }
  0x13   :  { %151 = vmatpush.msra.mxu2 %v144_v19  ;;  %v138_v25 = vld [vmem:[%s398_s5 + $0x40] sm:$0xff]  ;;  %v137_v26 = vld [vmem:[%s398_s5 + $0x38] sm:$0xff]  ;;  %v136_v27 = vld [vmem:[%s398_s5 + $0x30] sm:$0xff] }
  0x14   :  { %113 = vmatpush.msra.mxu1 %v100_v6  ;;  %v135_v28 = vld [vmem:[%s398_s5 + $0x28] sm:$0xff]  ;;  %v134_v29 = vld [vmem:[%s398_s5 + $0x20] sm:$0xff]  ;;  %v133_v30 = vld [vmem:[%s398_s5 + $0x18] sm:$0xff] }
  0x15   :  { %152 = vmatpush.msra.mxu2 %v143_v20  ;;  %v182_v31 = vld [vmem:[%s395_s2] ss:$0 sm:$0xff]  ;;  %v132_v35 = vld [vmem:[%s398_s5 + $0x10] sm:$0xff]  ;;  %v131_v36 = vld [vmem:[%s398_s5 + $0x8] sm:$0xff] }
  0x16   :  { %114 = vmatpush.msra.mxu1 %v99_v7  ;;  %v130_v37 = vld [vmem:[%s398_s5] sm:$0xff] }
  0x17   :  { %153 = vmatpush.msra.mxu2 %v142_v21  ;;  %v183_v38 = vld [vmem:[%s397_s4] ss:$0 sm:$0xff] }
  0x18   :  { %115 = vmatpush.msra.mxu1 %v98_v8  ;;  %v184_v42 = vld [vmem:[%s399_s6] ss:$0 sm:$0xff] }
  0x19   :  { %154 = vmatpush.msra.mxu2 %v141_v22 }
  0x1a   :  { %116 = vmatpush.msra.mxu1 %v97_v9 }
  0x1b   :  { %155 = vmatpush.msra.mxu2 %v140_v23 }
  0x1c   :  { %117 = vmatpush.msra.mxu1 %v96_v10 }
  0x1d   :  { %156 = vmatpush.msra.mxu2 %v139_v24 }
  0x1e   :  { %118 = vmatpush.msra.mxu1 %v95_v11 }
  0x1f   :  { %157 = vmatpush.msra.mxu2 %v138_v25 }
  0x20   :  { %119 = vmatpush.msra.mxu1 %v94_v12 }
  0x21   :  { %158 = vmatpush.msra.mxu2 %v137_v26 }
  0x22   :  { %120 = vmatpush.msra.mxu1 %v93_v13 }
  0x23   :  { %159 = vmatpush.msra.mxu2 %v136_v27 }
  0x24   :  { %121 = vmatpush.msra.mxu1 %v92_v14 }
  0x25   :  { %160 = vmatpush.msra.mxu2 %v135_v28 }
  0x26   :  { %122 = vmatpush.msra.mxu1 %v91_v15 }
  0x27   :  { %161 = vmatpush.msra.mxu2 %v134_v29 }
  0x28   :  { %123 = vmatpush.msra.mxu1 %v90_v16 }
  0x29   :  { %162 = vmatpush.msra.mxu2 %v133_v30 }
  0x2a   :  { %124 = vmatpush.msra.mxu1 %v89_v17 }
  0x2b   :  { %163 = vmatpush.msra.mxu2 %v132_v35 }
  0x2d   :  { %164 = vmatpush.msra.mxu2 %v131_v36 }
  0x2f   :  { %165 = vmatpush.msra.mxu2 %v130_v37 }
  0x89   :  { %v85_v32 = vpop.f32.mrf.mxu0 }
  0x8a   :  { %v86_v33 = vadd.f32 %v182_v31, %v85_v32 }
  0x8c   :  { %v88_v34 = vmax.f32 %v86_v33, 0.0 }
  0x8e   :  { %125 = vmatmul.f32.vlgmr.msra.gmra.mxu1 %v88_v34 }
 0x10b   :  { %v126_v39 = vpop.f32.mrf.mxu1 }
 0x10c   :  { %v127_v40 = vadd.f32 %v183_v38, %v126_v39 }
 0x10e   :  { %v129_v41 = vmax.f32 %v127_v40, 0.0 }
 0x110   :  { %166 = vmatmul.f32.vlgmr.msra.gmra.mxu2 %v129_v41 }
 0x193   :  { %v167_v43 = vpop.f32.mrf.mxu2 }
 0x194   :  { %v168_v44 = vadd.f32 %v184_v42, %v167_v43 }
 0x196   :  { %171 = vst.msk [vmem:[%s400_s7] sm:$0xff] %vm170_vm2, %v168_v44 }
 0x197   :  { %176 = vsyncpa [#allocation3], 1 }
 0x198   :  { %177 = vsyncpa [#allocation5], 1 }

</bundles_post_ra>
